<compile_context>
chip_gen: v5e
topology: v5e:2x2
jax: 0.10.0
libtpu: 0.0.40
codegen_flags: <defaults>
</compile_context>

<pallas_src>
import functools

import jax
import jax.numpy as jnp
from jax.experimental import pallas as pl
from jax.experimental.pallas import tpu as pltpu


def _round_up(x: int, m: int) -> int:
    return (x + m - 1) // m * m


def _vmem_capacity_bytes() -> int:
    try:
        cap = getattr(pltpu.get_tpu_info(), "vmem_capacity_bytes", None)
        if cap:
            return int(cap)
    except Exception:
        pass
    return 64 * 1024 * 1024  # conservative fallback: v7x per-TensorCore VMEM


def _working_set_bytes(tm: int, tf: int, d_model: int,
                       act_bytes: int, w_bytes: int) -> int:
    # All pallas_call inputs/outputs are double-buffered by the pipeline.
    tiles = 2 * 2 * tm * d_model * act_bytes        # x tile + out tile
    weights = 2 * 2 * tf * d_model * w_bytes        # w1 chunk + w2 chunk
    biases = 2 * (tf + d_model) * 4
    acc = tm * d_model * 4                          # f32 accumulator scratch
    h_tmp = tm * tf * (4 + w_bytes)                 # f32 h (+ cast copy)
    return tiles + weights + biases + acc + h_tmp


def _select_tiles(n_rows: int, d_model: int, d_ff: int,
                  act_bytes: int, w_bytes: int,
                  resident_budget: int, stream_budget: int):
    tm = min(1024 if n_rows >= 1024 else 512, _round_up(n_rows, 8))

    # Weight-resident fast path: whole d_ff in one block -> single k step,
    # grid-constant weight index_maps -> weights DMA'd once for the call.
    if _working_set_bytes(tm, d_ff, d_model, act_bytes, w_bytes) <= resident_budget:
        if _round_up(n_rows, tm) == tm and tm >= 16:
            # v7x has 2 TensorCores over the "parallel" row axis: make sure
            # there are >= 2 row tiles (free here — weights stay resident).
            half = _round_up(tm // 2, 8)
            if half < tm:
                tm = half
        return tm, d_ff

    # Streaming path: chunk d_ff.  Shrink tf before tm (weight reuse ~ tm).
    tf = d_ff if d_ff <= 512 else 512

    def fits(tm_, tf_):
        return _working_set_bytes(tm_, tf_, d_model, act_bytes, w_bytes) <= stream_budget

    if tf > 256 and not fits(tm, tf):
        tf = 256
    while tm > 8 and not fits(tm, tf):
        tm = max(8, _round_up(tm // 2, 8))
    return tm, tf


def ffn_kernel(x_ref, w1_ref, b1_ref, w2_ref, b2_ref, o_ref, acc_ref):
    # Grid = (row_tiles, dff_tiles); axis 1 is the d_ff reduction (last).
    # x_ref:   (TM, d_model)   row tile of flattened tokens
    # w1_ref:  (d_model, TF)   fc1 weight chunk (pre-transposed, K x N)
    # b1_ref:  (1, TF)         fc1 bias chunk (f32)
    # w2_ref:  (TF, d_model)   fc2 weight chunk (pre-transposed, K x N)
    # b2_ref:  (1, d_model)    fc2 bias (f32)
    # o_ref:   (TM, d_model)
    # acc_ref: (TM, d_model)   f32 accumulator, resident across the k axis
    k = pl.program_id(1)

    @pl.when(k == 0)
    def _():
        acc_ref[...] = jnp.zeros_like(acc_ref)

    # h = ReLU(x @ w1_chunk + b1_chunk): natural (M,K)@(K,N) MXU form,
    # native-dtype operands, f32 accumulation.
    h = jnp.dot(x_ref[...], w1_ref[...], preferred_element_type=jnp.float32)
    h = jnp.maximum(h + b1_ref[...], 0.0)

    # Partial fc2: acc += h_chunk @ w2_chunk  (f32 accumulate).
    acc_ref[...] += jnp.dot(h.astype(w2_ref.dtype), w2_ref[...],
                            preferred_element_type=jnp.float32)

    @pl.when(k == pl.num_programs(1) - 1)
    def _():
        o_ref[...] = (acc_ref[...] + b2_ref[...]).astype(o_ref.dtype)


@functools.partial(jax.jit, static_argnames=("compute_dtype", "tm", "tf"))
def position_wise_fc(x, w1, b1, w2, b2, *, compute_dtype=None, tm=None, tf=None):
    """Fused FFN: Dropout(fc2(ReLU(fc1(x)))), eval-mode dropout (identity).

    x:  (batch, seq, d_model)
    w1: (d_ff, d_model), b1: (d_ff,)      -- PyTorch nn.Linear layout
    w2: (d_model, d_ff), b2: (d_model,)
    compute_dtype: optional MXU ingest dtype (e.g. jnp.bfloat16); accumulation
        stays f32 and the output keeps x.dtype.
    tm / tf: optional manual tile overrides (tf must be a multiple of 128 when
        smaller than d_ff); default is auto, VMEM-budget aware.
    """
    batch, seq, d_model = x.shape
    d_ff = w1.shape[0]
    n_rows = batch * seq

    # One-time layout fixes in the wrapper: natural (M,K)@(K,N) matmuls on the
    # MXU and contiguous leading-dim weight chunks for fc2.
    w1t = w1.T                      # (d_model, d_ff)
    w2t = w2.T                      # (d_ff, d_model)
    x2d = x.reshape(n_rows, d_model)
    if compute_dtype is not None:
        x2d = x2d.astype(compute_dtype)
        w1t = w1t.astype(compute_dtype)
        w2t = w2t.astype(compute_dtype)

    act_bytes = x2d.dtype.itemsize
    w_bytes = w1t.dtype.itemsize

    # Generation-aware VMEM budgets (v7x: 64 MiB/TC, v5e/v6e: 128 MiB).
    cap = _vmem_capacity_bytes()
    vmem_limit = max(32 << 20, min(int(0.85 * cap), 110 << 20))
    resident_budget = int(0.65 * cap)
    stream_budget = int(0.70 * cap)

    tm_auto, tf_auto = _select_tiles(n_rows, d_model, d_ff, act_bytes, w_bytes,
                                     resident_budget, stream_budget)
    tm_eff = tm_auto if tm is None else min(_round_up(tm, 8), _round_up(n_rows, 8))
    tf_eff = tf_auto if tf is None else min(tf, d_ff)

    n_rows_pad = _round_up(n_rows, tm_eff)
    d_ff_pad = d_ff if tf_eff == d_ff else _round_up(d_ff, tf_eff)
    resident = (tf_eff == d_ff_pad)      # single k step -> weights DMA'd once

    if n_rows_pad != n_rows:
        x2d = jnp.pad(x2d, ((0, n_rows_pad - n_rows), (0, 0)))
    if d_ff_pad != d_ff:
        # Exact: padded hidden units see ReLU(0 + 0) = 0 through zero fc2 rows.
        w1t = jnp.pad(w1t, ((0, 0), (0, d_ff_pad - d_ff)))
        b1 = jnp.pad(b1, (0, d_ff_pad - d_ff))
        w2t = jnp.pad(w2t, ((0, d_ff_pad - d_ff), (0, 0)))
    b1_2d = b1.reshape(1, d_ff_pad).astype(jnp.float32)
    b2_2d = b2.reshape(1, d_model).astype(jnp.float32)

    grid = (n_rows_pad // tm_eff, d_ff_pad // tf_eff)
    weight_passes = 1 if resident else grid[0]

    flops = 4 * n_rows * d_model * d_ff  # two matmuls
    bytes_accessed = (
        2 * n_rows_pad * d_model * act_bytes                 # x + out
        + weight_passes * 2 * d_model * d_ff_pad * w_bytes   # w1 + w2
        + 4 * (d_ff_pad + d_model))                          # biases

    out2d = pl.pallas_call(
        ffn_kernel,
        out_shape=jax.ShapeDtypeStruct((n_rows_pad, d_model), x.dtype),
        grid_spec=pltpu.PrefetchScalarGridSpec(
            num_scalar_prefetch=0,
            grid=grid,
            in_specs=[
                pl.BlockSpec((tm_eff, d_model), lambda i, k: (i, 0)),
                pl.BlockSpec((d_model, tf_eff), lambda i, k: (0, k)),
                pl.BlockSpec((1, tf_eff), lambda i, k: (0, k)),
                pl.BlockSpec((tf_eff, d_model), lambda i, k: (k, 0)),
                pl.BlockSpec((1, d_model), lambda i, k: (0, 0)),
            ],
            out_specs=pl.BlockSpec((tm_eff, d_model), lambda i, k: (i, 0)),
            scratch_shapes=[pltpu.VMEM((tm_eff, d_model), jnp.float32)],
        ),
        compiler_params=pltpu.CompilerParams(
            dimension_semantics=("parallel", "arbitrary"),
            vmem_limit_bytes=int(vmem_limit),
        ),
        cost_estimate=pl.CostEstimate(
            flops=int(flops), transcendentals=0,
            bytes_accessed=int(bytes_accessed)),
    )(x2d, w1t, b1_2d, w2t, b2_2d)

    if n_rows_pad != n_rows:
        out2d = out2d[:n_rows]
    return out2d.reshape(batch, seq, d_model)


if __name__ == "__main__":
    d_model, d_ff = 32, 64
    batch, seq = 2, 8

    key = jax.random.PRNGKey(0)
    kx, k1, k2, k3, k4 = jax.random.split(key, 5)

    x = jax.random.normal(kx, (batch, seq, d_model), dtype=jnp.float32)
    w1 = jax.random.normal(k1, (d_ff, d_model), dtype=jnp.float32) * 0.1
    b1 = jax.random.normal(k2, (d_ff,), dtype=jnp.float32) * 0.1
    w2 = jax.random.normal(k3, (d_model, d_ff), dtype=jnp.float32) * 0.1
    b2 = jax.random.normal(k4, (d_model,), dtype=jnp.float32) * 0.1

    ref = jnp.maximum(x @ w1.T + b1, 0.0) @ w2.T + b2

    # 1) Auto-tiled (hits the weight-resident fast path at these shapes).
    out = position_wise_fc(x, w1, b1, w2, b2)
    jax.block_until_ready(out)
    assert out.shape == (batch, seq, d_model)
    assert jnp.allclose(out, ref, atol=1e-4, rtol=1e-4), "mismatch (resident)"

    # 2) Exercise the streaming / d_ff-reduction path (k grid axis > 1).
    d_ff2 = 256
    k5, k6 = jax.random.split(k4, 2)
    w1b = jax.random.normal(k5, (d_ff2, d_model), dtype=jnp.float32) * 0.1
    b1b = jnp.zeros((d_ff2,), dtype=jnp.float32)
    w2b = jax.random.normal(k6, (d_model, d_ff2), dtype=jnp.float32) * 0.1
    b2b = jnp.zeros((d_model,), dtype=jnp.float32)
    ref2 = jnp.maximum(x @ w1b.T + b1b, 0.0) @ w2b.T + b2b
    out2 = position_wise_fc(x, w1b, b1b, w2b, b2b, tm=8, tf=128)
    jax.block_until_ready(out2)
    assert jnp.allclose(out2, ref2, atol=1e-4, rtol=1e-4), "mismatch (streaming)"

    # 3) bf16 MXU-ingest path (mixed precision, f32 accumulation).
    out3 = position_wise_fc(x, w1, b1, w2, b2, compute_dtype=jnp.bfloat16)
    jax.block_until_ready(out3)
    assert jnp.allclose(out3, ref, atol=1e-1, rtol=1e-1), "mismatch (bf16)"

    print("KERNEL_OK")
</pallas_src>

<mosaic_0001>
module attributes {stable_mosaic.version = 11 : i64} {
  func.func @ffn_kernel(%arg0: i32, %arg1: i32, %arg2: memref<8x32xf32, #tpu.memory_space<vmem>>, %arg3: memref<32x64xf32, #tpu.memory_space<vmem>>, %arg4: memref<1x64xf32, #tpu.memory_space<vmem>>, %arg5: memref<64x32xf32, #tpu.memory_space<vmem>>, %arg6: memref<1x32xf32, #tpu.memory_space<vmem>>, %arg7: memref<8x32xf32, #tpu.memory_space<vmem>>, %arg8: memref<8x32xf32, #tpu.memory_space<vmem>>) attributes {dimension_semantics = [#tpu.dimension_semantics<parallel>, #tpu.dimension_semantics<arbitrary>], iteration_bounds = array<i64: 2, 1>, scalar_prefetch = 0 : i64, scratch_operands = 1 : i64, tpu.core_type = #tpu.core_type<tc>, window_params = [{transform_indices = @transform_0, window_bounds = array<i64: 8, 32>}, {transform_indices = @transform_1, window_bounds = array<i64: 32, 64>}, {transform_indices = @transform_2, window_bounds = array<i64: 1, 64>}, {transform_indices = @transform_3, window_bounds = array<i64: 64, 32>}, {pipeline_mode = #tpu.pipeline_mode<synchronous>, transform_indices = @transform_4, window_bounds = array<i64: 1, 32>}, {transform_indices = @transform_5, window_bounds = array<i64: 8, 32>}]} {
    %c0_i32 = arith.constant 0 : i32
    %0 = arith.cmpi eq, %arg1, %c0_i32 : i32
    %1 = arith.extui %0 : i1 to i32
    %c0_i32_0 = arith.constant 0 : i32
    %2 = arith.cmpi ne, %1, %c0_i32_0 : i32
    scf.if %2 {
      %cst_16 = arith.constant 0.000000e+00 : f32
      %19 = vector.broadcast %cst_16 : f32 to vector<8x32xf32>
      %c0_17 = arith.constant 0 : index
      %c0_18 = arith.constant 0 : index
      %20 = vector.load %arg8[%c0_17, %c0_18] : memref<8x32xf32, #tpu.memory_space<vmem>>, vector<8x32xf32>
      tpu.vector_store %arg8[%c0_17, %c0_18], %19 {strides = array<i32>} : memref<8x32xf32, #tpu.memory_space<vmem>>, vector<8x32xf32>,
    } else {
    }
    %c0 = arith.constant 0 : index
    %c0_1 = arith.constant 0 : index
    %3 = vector.load %arg2[%c0, %c0_1] : memref<8x32xf32, #tpu.memory_space<vmem>>, vector<8x32xf32>
    %c0_2 = arith.constant 0 : index
    %c0_3 = arith.constant 0 : index
    %4 = vector.load %arg3[%c0_2, %c0_3] : memref<32x64xf32, #tpu.memory_space<vmem>>, vector<32x64xf32>
    %cst = arith.constant dense<0.000000e+00> : vector<8x64xf32>
    %5 = tpu.matmul %3, %4, %cst {dimension_numbers = #tpu.dot_dimension_numbers<[1], [0], [0], [1], [0, 0, 1, 1], [], []>} : vector<8x32xf32>, vector<32x64xf32>, vector<8x64xf32> -> vector<8x64xf32>
    %c0_4 = arith.constant 0 : index
    %c0_5 = arith.constant 0 : index
    %6 = vector.load %arg4[%c0_4, %c0_5] : memref<1x64xf32, #tpu.memory_space<vmem>>, vector<1x64xf32>
    %7 = vector.broadcast %6 : vector<1x64xf32> to vector<8x64xf32>
    %8 = arith.addf %5, %7 : vector<8x64xf32>
    %cst_6 = arith.constant 0.000000e+00 : f32
    %9 = vector.broadcast %cst_6 : f32 to vector<8x64xf32>
    %10 = arith.maximumf %8, %9 : vector<8x64xf32>
    %c0_7 = arith.constant 0 : index
    %c0_8 = arith.constant 0 : index
    %11 = vector.load %arg8[%c0_7, %c0_8] : memref<8x32xf32, #tpu.memory_space<vmem>>, vector<8x32xf32>
    %c0_9 = arith.constant 0 : index
    %c0_10 = arith.constant 0 : index
    %12 = vector.load %arg5[%c0_9, %c0_10] : memref<64x32xf32, #tpu.memory_space<vmem>>, vector<64x32xf32>
    %cst_11 = arith.constant dense<0.000000e+00> : vector<8x32xf32>
    %13 = tpu.matmul %10, %12, %cst_11 {dimension_numbers = #tpu.dot_dimension_numbers<[1], [0], [0], [1], [0, 0, 1, 1], [], []>} : vector<8x64xf32>, vector<64x32xf32>, vector<8x32xf32> -> vector<8x32xf32>
    %14 = arith.addf %11, %13 : vector<8x32xf32>
    %c0_12 = arith.constant 0 : index
    %c0_13 = arith.constant 0 : index
    %15 = vector.load %arg8[%c0_12, %c0_13] : memref<8x32xf32, #tpu.memory_space<vmem>>, vector<8x32xf32>
    tpu.vector_store %arg8[%c0_12, %c0_13], %14 {strides = array<i32>} : memref<8x32xf32, #tpu.memory_space<vmem>>, vector<8x32xf32>,
    %c0_i32_14 = arith.constant 0 : i32
    %16 = arith.cmpi eq, %arg1, %c0_i32_14 : i32
    %17 = arith.extui %16 : i1 to i32
    %c0_i32_15 = arith.constant 0 : i32
    %18 = arith.cmpi ne, %17, %c0_i32_15 : i32
    scf.if %18 {
      %c0_16 = arith.constant 0 : index
      %c0_17 = arith.constant 0 : index
      %19 = vector.load %arg8[%c0_16, %c0_17] : memref<8x32xf32, #tpu.memory_space<vmem>>, vector<8x32xf32>
      %c0_18 = arith.constant 0 : index
      %c0_19 = arith.constant 0 : index
      %20 = vector.load %arg6[%c0_18, %c0_19] : memref<1x32xf32, #tpu.memory_space<vmem>>, vector<1x32xf32>
      %21 = vector.broadcast %20 : vector<1x32xf32> to vector<8x32xf32>
      %22 = arith.addf %19, %21 : vector<8x32xf32>
      %c0_20 = arith.constant 0 : index
      %c0_21 = arith.constant 0 : index
      %23 = vector.load %arg7[%c0_20, %c0_21] : memref<8x32xf32, #tpu.memory_space<vmem>>, vector<8x32xf32>
      tpu.vector_store %arg7[%c0_20, %c0_21], %22 {strides = array<i32>} : memref<8x32xf32, #tpu.memory_space<vmem>>, vector<8x32xf32>,
    } else {
    }
    return
  }
  func.func @transform_0(%arg0: i32, %arg1: i32) -> (i32, i32) {
    %c0_i32 = arith.constant 0 : i32
    %c0_i32_0 = arith.constant 0 : i32
    return %arg0, %c0_i32 : i32, i32
  }
  func.func @transform_1(%arg0: i32, %arg1: i32) -> (i32, i32) {
    %c0_i32 = arith.constant 0 : i32
    %c0_i32_0 = arith.constant 0 : i32
    return %c0_i32, %arg1 : i32, i32
  }
  func.func @transform_2(%arg0: i32, %arg1: i32) -> (i32, i32) {
    %c0_i32 = arith.constant 0 : i32
    %c0_i32_0 = arith.constant 0 : i32
    return %c0_i32, %arg1 : i32, i32
  }
  func.func @transform_3(%arg0: i32, %arg1: i32) -> (i32, i32) {
    %c0_i32 = arith.constant 0 : i32
    %c0_i32_0 = arith.constant 0 : i32
    return %arg1, %c0_i32 : i32, i32
  }
  func.func @transform_4(%arg0: i32, %arg1: i32) -> (i32, i32) {
    %c0_i32 = arith.constant 0 : i32
    %c0_i32_0 = arith.constant 0 : i32
    %c0_i32_1 = arith.constant 0 : i32
    return %c0_i32, %c0_i32_0 : i32, i32
  }
  func.func @transform_5(%arg0: i32, %arg1: i32) -> (i32, i32) {
    %c0_i32 = arith.constant 0 : i32
    %c0_i32_0 = arith.constant 0 : i32
    return %arg0, %c0_i32 : i32, i32
  }
}

</mosaic_0001>

<bundles_post_ra>
// kernel: position_wise_fc.1
= control target key start
LH: loop header
LB: loop body
LE: loop exit
PB: predicated region body
PF: predicated region fallthrough
CT: control target
= control target key end

     0   :  { %10 = vsyncpa [#allocation4], 0  ;;  %s823_s0 = inlined_call_operand.vmem [shape: f32[16,32], index: 0, kind: input, shape index: {}]   ;;  %s824_s1 = inlined_call_operand.vmem [shape: f32[32,64], index: 1, kind: input, shape index: {}]   ;;  %s825_s2 = inlined_call_operand.vmem [shape: f32[1,64], index: 2, kind: input, shape index: {}]   ;;  %s826_s3 = inlined_call_operand.vmem [shape: f32[64,32], index: 3, kind: input, shape index: {}]   ;;  %s827_s4 = inlined_call_operand.vmem [shape: f32[1,32], index: 4, kind: input, shape index: {}]   ;;  %s828_s5 = inlined_call_operand.hbm [shape: f32[16,32], index: 5, kind: output, shape index: {}]  }
   0x1   :  { %12 = vsyncpa [#allocation4 + $0x1], 0  ;;  %s680_s18 = smov 0   ;;  %s682_s19 = smov 0  }
   0x2   :  { %s684_s20 = smov 0   ;;  %s686_s21 = smov 0  }
   0x3   :  { %s688_s22 = smov 0   ;;  %s690_s23 = smov 0  }
   0x4 LB: > { %s495_s24 = sadd.s32 4294967295, %s647_s23   ;;  %s496_s25 = sadd.s32 4294967294, %s647_s23   ;;  %s647_s23 = sphi %s690_s23, %s18_s23   ;;  %s643_s22 = sphi %s688_s22, %s835_s22   ;;  %s639_s21 = sphi %s686_s21, %s834_s21   ;;  %s635_s20 = sphi %s684_s20, %s833_s20   ;;  %s631_s19 = sphi %s682_s19, %s832_s19   ;;  %s627_s18 = sphi %s680_s18, %s831_s18  }
   0x5   : > { %s30_s26 = sadd.s32 1, %s643_s22  ;;  %s162_s27 = sadd.s32 1, %s635_s20 }
   0x6   : > { %p32_p0 = scmp.ge.s32.totalorder %s30_s26, 2  ;;  %p172_p1 = scmp.ne.s32.totalorder %s635_s20, %s631_s19 }
   0x7   : > { %p173_p2 = scmp.eq.s32.totalorder %s495_s24, 1  ;;  %p178_p3 = scmp.ne.s32.totalorder %s631_s19, %s627_s18 }
   0x8   : > { %s837_s26 = smov (%p32_p0, %s30_s26), 0  ;;  %p179_p5 = scmp.eq.s32.totalorder %s496_s25, 1 }
   0x9   : > { %p720_p4 = por %p173_p2, %p172_p1  ;;  %s159_s29 = ssub.s32 %s643_s22, %s837_s26 }
   0xa   : > { %p502_p6 = scmp.ge.s32.totalorder %s647_s23, 1  ;;  %p160_p7 = scmp.eq.s32.totalorder %s159_s29, 0 }
   0xb   : > { %p727_p8 = por %p179_p5, %p178_p3  ;;  %p229_p9 = scmp.lt.s32.totalorder %s647_s23, 3 }
   0xc   : > { %s733_s6 = scalar_select %p160_p7, %s635_s20, %s162_s27  }
   0xd   : > { %p230_p10 = pnand %p502_p6, %p229_p9 }
   0xe   : > { %p268_p11 = scmp.lt.s32.totalorder (!%p230_p10), %s639_s21, 1  ;;  %s265_s8 = sand.u32 (!%p230_p10), 1, %s631_s19  }
   0xf   : > { %233 = sbr.rel (%p230_p10) target bundleno = 299 (0x12b), region = 40  ;;  %s503_s9 = sshll.u32 (!%p230_p10), %s265_s8, 3 }
  0x10   : > { %s267_s16 = scalar_lea.vmem (!%p230_p10), [#allocation3], %s503_s9  ;;  %s589_s9 = scalar_lea.hbm (!%p230_p10), %s828_s5, 16 }
  0x14   : > { %v295_v0 = vld [vmem:[%s824_s1 + $0x18] sm:$0xff]  ;;  %v294_v1 = vld [vmem:[%s824_s1 + $0x10] sm:$0xff]  ;;  %vm289_vm0 = vcmask 261120   ;;  %v649_v2 = vmov 0.0   ;;  %v293_v5 = vld [vmem:[%s824_s1 + $0x8] sm:$0xff]  ;;  %s269_s17 = scalar_select %p268_p11, %s639_s21, 1 }
  0x15   : > { %316 = vmatpush.msra.mxu0 %v295_v0  ;;  %290 = vst.msk [vmem:[#allocation2] sm:$0xff] %vm289_vm0, %v649_v2  ;;  %v333_v3 = vld [vmem:[%s826_s3 + $0x38] sm:$0xff]  ;;  %v332_v4 = vld [vmem:[%s826_s3 + $0x30] sm:$0xff]  ;;  %v331_v6 = vld [vmem:[%s826_s3 + $0x28] sm:$0xff]  ;;  %vm334_vm1 = vcmask 523264  }
  0x16   : > { %346 = vmatpush.msra.mxu1 %v333_v3  ;;  %v292_v7 = vld [vmem:[%s824_s1] sm:$0xff]  ;;  %s504_s7 = sshll.u32 %s269_s17, 3  ;;  %v329_v10 = vld [vmem:[%s826_s3 + $0x18] sm:$0xff]  ;;  %v328_v11 = vld [vmem:[%s826_s3 + $0x10] sm:$0xff]  ;;  %s383_s17 = sshll.u32 %s267_s16, 4  ;;  %s384_s17 = int_to_ptr.vmem [resolvable:$true] %s383_s17 }
  0x17   : > { %317 = vmatpush.msra.mxu0 %v294_v1  ;;  %s271_s10 = scalar_lea.vmem %s823_s0, %s504_s7  ;;  %v330_v8 = vld [vmem:[%s826_s3 + $0x20] sm:$0xff]  ;;  %v327_v12 = vld [vmem:[%s826_s3 + $0x8] sm:$0xff] }
  0x18   : > { %347 = vmatpush.msra.mxu1 %v332_v4  ;;  %v291_v9 = vld [vmem:[%s271_s10] sm:$0xff]  ;;  %s508_s10 = sshll.u32 %s639_s21, 3  ;;  %s371_s21 = scalar_lea.sflag [#allocation4], %s265_s8 }
  0x19   : > { %318 = vmatpush.msra.mxu0 %v293_v5  ;;  %v326_v13 = vld [vmem:[%s826_s3] sm:$0xff]  ;;  %s381_s13 = scalar_lea.hbm %s828_s5, %s508_s10 }
  0x1a   : > { %348 = vmatpush.msra.mxu1 %v331_v6  ;;  %v567_v14 = vld [vmem:[%s825_s2] ss:$0 sm:$0xff]  ;;  %s385_s24 = sshll.u32 %s381_s13, 4  ;;  %s386_s24 = int_to_ptr.hbm [resolvable:$true] %s385_s24 }
  0x1b   : > { %319 = vmatpush.msra.mxu0 %v292_v7  ;;  %v568_v21 = vld [vmem:[%s827_s4] ss:$0 sm:$0xff]  ;;  %s583_s25 = sshra.s32 %s386_s24, 4  ;;  %s584_s25 = int_to_ptr.hbm [resolvable:$true] %s583_s25 }
  0x1c   : > { %505 = vmatmul.msk.f32.vlgmr.msra.gmra.mxu0 %vm289_vm0, %v291_v9  ;;  %349 = vmatpush.msra.mxu1 %v330_v8  ;;  %v325_v18 = vld [vmem:[#allocation2] sm:$0xff]  ;;  %s585_s27 = scalar_lea.hbm %s584_s25, 8  ;;  %p590_p1 = scmp.lt.s32.totalorder %s584_s25, %s828_s5 }
  0x1d   : > { %p586_p12 = scmp.ne.s32.totalorder %s584_s25, %s585_s27  ;;  %p591_p2 = scmp.lt.s32.totalorder %s589_s9, %s585_s27 }
  0x1e   : > { %350 = vmatpush.msra.mxu1 %v329_v10 }
  0x1f   : > { %p587_p13 = pnand %p586_p12, %p720_p4  ;;  %p592_p3 = por %p591_p2, %p590_p1 }
  0x20   : > { %351 = vmatpush.msra.mxu1 %v328_v11 }
  0x21   : > { %p588_p0 = pneg %p587_p13 }
  0x22   : > { %352 = vmatpush.msra.mxu1 %v327_v12 }
  0x23   : > { %p593_p5 = pnand %p592_p3, %p588_p0 }
  0x24   : > { %353 = vmatpush.msra.mxu1 %v326_v13 }
  0x99   : > { %v321_v15 = vpop.f32.mrf.mxu0 }
  0x9a   : > { %v322_v16 = vadd.f32 %v567_v14, %v321_v15 }
  0x9c   : > { %v324_v17 = vmax.f32 %v322_v16, 0.0 }
  0x9e   : > { %506 = vmatmul.msk.f32.vlgmr.msra.gmra.mxu1 %vm334_vm1, %v324_v17 }
 0x11b   : > { %v355_v19 = vpop.f32.mrf.mxu1 }
 0x11c   : > { %v358_v20 = vadd.f32 %v355_v19, %v325_v18 }
 0x11e   : > { %359 = vst.msk [vmem:[#allocation2] sm:$0xff] %vm289_vm0, %v358_v20 }
 0x125   : > { %v363_v22 = vld [vmem:[#allocation2] sm:$0xff] }
 0x126   : > { %v368_v23 = vadd.f32 %v568_v21, %v363_v22 }
 0x128   : > { %369 = vst.msk [vmem:[%s267_s16] sm:$0xff] %vm289_vm0, %v368_v23 }
 0x129   : > { %596 = shalt.err (!%p593_p5)
}
 0x12a   : > { %511 = dma.vmem_to_hbm [thread:$0]  (%p720_p4), %s384_s17, 128, %s386_s24, %s371_s21  }
 0x12b PF: > { %p517_p6 = scmp.ge.s32.totalorder %s647_s23, 2  ;;  %s397_s8 = sand.u32 1, %s627_s18  }
 0x12c   : > { %s398_s12 = scalar_lea.sflag [#allocation4], %s397_s8 }
 0x12d   : > { %p514_p7 = pnand %p517_p6, %p727_p8 }
 0x12f   : > { %p515_p9 = pneg %p514_p7 }
 0x131   : > { %622 = dma.done.wait (%p515_p9), %s398_s12, 128  }
 0x132   : > { %624 = vsyncadd (%p515_p9), %s398_s12, 4294967168  ;;  %s18_s23 = sadd.s32 1, %s647_s23   ;;  %s831_s18 = smov %s631_s19 }
 0x133   : > { %p15_p10 = scmp.ge.s32.totalorder %s18_s23, 4   ;;  %s832_s19 = smov %s635_s20 }
 0x134   : > { %s833_s20 = smov %s733_s6  ;;  %s834_s21 = smov %s643_s22 }
 0x135   : > { %s835_s22 = smov %s837_s26  ;;  %17 = sbr.rel (!%p15_p10) target bundleno = 4 (0x4), region = 92 }
 0x13a   :  { %404 = vsyncpa [#allocation4], 1 }
 0x13b   :  { %406 = vsyncpa [#allocation4 + $0x1], 1 }

</bundles_post_ra>
